<compile_context>
chip_gen: v7x
topology: tpu7x:2x2x1
jax: 0.10.0
libtpu: 0.0.40
codegen_flags: <defaults>
</compile_context>

<pallas_src>
import functools

import jax
import jax.numpy as jnp
import numpy as np
from jax import lax
from jax.experimental import pallas as pl
from jax.experimental.pallas import tpu as pltpu


def _channel_attention_kernel(gamma_ref, x_ref, o_ref, energy_ref, attn_ref,
                              *, attend_elsewhere, compute_dtype, approx_recip):
    p = pl.program_id(1)    # 0: accumulate Gram matrix; 1: apply attention
    nk = pl.program_id(2)   # spatial (N) chunk index

    @pl.when(jnp.logical_and(p == 0, nk == 0))
    def _init():
        energy_ref[...] = jnp.zeros_like(energy_ref)

    @pl.when(p == 0)
    def _accumulate():
        xb = x_ref[...].astype(compute_dtype)              # (bt, C, tn)
        # energy[b, c, d] += sum_n x[b, c, n] * x[b, d, n]  (contract N, no x.T)
        energy_ref[...] += lax.dot_general(
            xb, xb,
            dimension_numbers=(((2,), (2,)), ((0,), (0,))),
            preferred_element_type=jnp.float32)

    @pl.when(jnp.logical_and(p == 1, nk == 0))
    def _softmax():
        energy = energy_ref[...]                            # (bt, C, C) f32
        if attend_elsewhere:
            # softmax(colmax - E, axis=1) == softmax(-E, axis=1); stabilize with
            # the per-column min so all logits (colmin - E) are <= 0.
            m = jnp.min(energy, axis=1, keepdims=True)
            e = jnp.exp(m - energy)
        else:
            m = jnp.max(energy, axis=1, keepdims=True)
            e = jnp.exp(energy - m)
        denom = jnp.sum(e, axis=1, keepdims=True)
        attn = e * pl.reciprocal(denom, approx=approx_recip)
        attn_ref[...] = attn.astype(attn_ref.dtype)

    @pl.when(p == 1)
    def _apply():
        xv = x_ref[...]                                     # (bt, C, tn)
        # out[b, c, n] = sum_d attn[b, c, d] * x[b, d, n]
        out = lax.dot_general(
            attn_ref[...], xv.astype(compute_dtype),
            dimension_numbers=(((2,), (1,)), ((0,), (0,))),
            preferred_element_type=jnp.float32)
        gamma = gamma_ref[0]
        o_ref[...] = (gamma * out + xv.astype(jnp.float32)).astype(o_ref.dtype)


def _pick_batch_tile(B, C):
    # Small CxC Gram matrices badly underfill the MXU; amortize per-grid-step
    # overhead by processing several batch elements per step when C is small.
    if C > 128:
        return 1
    for cand in (8, 4, 2, 1):
        if cand <= B and B % cand == 0:
            return cand
    return 1


def _pick_spatial_tile(N, C, bt, itemsize, target_bytes=4 << 20):
    # Largest multiple-of-128 chunk that divides N and keeps one x block under
    # ~4 MiB (so in+out double buffers + (C,C) scratch fit every chip's VMEM).
    divisible = [c for c in (4096, 2048, 1024, 512, 256, 128) if N % c == 0]
    for cand in divisible:
        if bt * C * cand * itemsize <= target_bytes:
            return cand
    if divisible:
        return divisible[-1]
    return N  # odd N: single full-extent chunk (legal: block dim == array dim)


def channel_attention(inputs, gamma, *, attend_elsewhere=True, precision="bf16"):
    """inputs: (B, C, H, W); gamma: (1,). Returns (B, C, H, W)."""
    B, C, H, W = inputs.shape
    N = H * W
    x3 = inputs.reshape(B, C, N)
    itemsize = jnp.dtype(inputs.dtype).itemsize

    if precision == "bf16":
        compute_dtype = jnp.bfloat16
        approx_recip = True
    else:
        compute_dtype = jnp.float32
        approx_recip = False

    bt = _pick_batch_tile(B, C)
    tn = _pick_spatial_tile(N, C, bt, itemsize)
    num_nk = N // tn
    grid = (B // bt, 2, num_nk)

    kernel = functools.partial(
        _channel_attention_kernel,
        attend_elsewhere=attend_elsewhere,
        compute_dtype=compute_dtype,
        approx_recip=approx_recip)

    block_bytes = bt * C * tn * itemsize
    scratch_bytes = bt * C * C * (4 + jnp.dtype(compute_dtype).itemsize)
    vmem_limit = int(min(48 << 20,
                         max(24 << 20, 4 * block_bytes + scratch_bytes + (4 << 20))))

    cost = pl.CostEstimate(
        flops=4 * B * C * C * N,            # two batched CxCxN matmuls
        transcendentals=B * C * C,          # softmax exps
        bytes_accessed=3 * B * C * N * itemsize)  # x read twice + out written

    out3 = pl.pallas_call(
        kernel,
        out_shape=jax.ShapeDtypeStruct((B, C, N), inputs.dtype),
        grid=grid,
        in_specs=[
            pl.BlockSpec(memory_space=pltpu.SMEM),                  # gamma (1,)
            pl.BlockSpec((bt, C, tn), lambda b, p, k: (b, 0, k)),   # x chunk
        ],
        # During pass 0 the output block index is pinned to chunk 0 (k*p == 0),
        # so the (never-written) buffer stays resident and no garbage reaches
        # HBM; pass 1 writes each chunk exactly once.
        out_specs=pl.BlockSpec((bt, C, tn), lambda b, p, k: (b, 0, k * p)),
        scratch_shapes=[
            pltpu.VMEM((bt, C, C), jnp.float32),     # Gram / energy accumulator
            pltpu.VMEM((bt, C, C), compute_dtype),   # softmax attention
        ],
        compiler_params=pltpu.CompilerParams(
            dimension_semantics=("parallel", "arbitrary", "arbitrary"),
            vmem_limit_bytes=vmem_limit),
        cost_estimate=cost,
    )(gamma, x3)

    return out3.reshape(B, C, H, W)


def _reference(inputs, gamma, attend_elsewhere=True):
    B, C, H, W = inputs.shape
    x = inputs.reshape(B, C, -1).astype(jnp.float32)
    energy = jnp.einsum("bcn,bdn->bcd", x, x)
    if attend_elsewhere:
        diag = jnp.max(energy, axis=1, keepdims=True)
        energy = diag - energy
    attention = jax.nn.softmax(energy, axis=1)
    out = jnp.einsum("bcd,bdn->bcn", attention, x).reshape(B, C, H, W)
    return gamma * out + inputs


if __name__ == "__main__":
    B, C, H, W = 2, 4, 16, 16
    key = jax.random.PRNGKey(0)
    x = jax.random.normal(key, (B, C, H, W), dtype=jnp.float32)

    # Module init is gamma = zeros(1); use a nonzero deterministic value so the
    # attention path actually contributes to the output being checked.
    gamma = jnp.full((1,), 0.5, dtype=jnp.float32)

    ref = _reference(x, gamma, attend_elsewhere=True)

    # Full-precision path: near-exact check (min-fold of attend_elsewhere and
    # MXU accumulation order introduce only ~1e-4-level differences).
    out_f32 = jax.block_until_ready(
        channel_attention(x, gamma, attend_elsewhere=True, precision="f32"))
    np.testing.assert_allclose(np.asarray(out_f32), np.asarray(ref),
                               rtol=1e-3, atol=1e-3)

    # Default fast path: bf16 MXU operands + approx reciprocal -> relaxed tol.
    out_bf16 = jax.block_until_ready(
        channel_attention(x, gamma, attend_elsewhere=True, precision="bf16"))
    np.testing.assert_allclose(np.asarray(out_bf16), np.asarray(ref),
                               rtol=5e-2, atol=5e-2)

    print("KERNEL_OK")
</pallas_src>

<mosaic_0001>
module attributes {stable_mosaic.version = 11 : i64} {
  func.func @_channel_attention_kernel(%arg0: i32, %arg1: i32, %arg2: i32, %arg3: memref<1xf32, #tpu.memory_space<smem>>, %arg4: memref<2x4x256xf32, #tpu.memory_space<vmem>>, %arg5: memref<2x4x256xf32, #tpu.memory_space<vmem>>, %arg6: memref<2x4x4xf32, #tpu.memory_space<vmem>>, %arg7: memref<2x4x4xf32, #tpu.memory_space<vmem>>) attributes {dimension_semantics = [#tpu.dimension_semantics<parallel>, #tpu.dimension_semantics<arbitrary>, #tpu.dimension_semantics<arbitrary>], iteration_bounds = array<i64: 1, 2, 1>, scalar_prefetch = 0 : i64, scratch_operands = 2 : i64, tpu.core_type = #tpu.core_type<tc>, window_params = [{transform_indices = @transform_0, window_bounds = array<i64: 1>}, {transform_indices = @transform_1, window_bounds = array<i64: 2, 4, 256>}, {transform_indices = @transform_2, window_bounds = array<i64: 2, 4, 256>}]} {
    %c0_i32 = arith.constant 0 : i32
    %0 = arith.cmpi eq, %arg1, %c0_i32 : i32
    %c0_i32_0 = arith.constant 0 : i32
    %1 = arith.cmpi eq, %arg2, %c0_i32_0 : i32
    %2 = arith.andi %0, %1 : i1
    %3 = arith.extui %2 : i1 to i32
    %c0_i32_1 = arith.constant 0 : i32
    %4 = arith.cmpi ne, %3, %c0_i32_1 : i32
    scf.if %4 {
      %cst = arith.constant 0.000000e+00 : f32
      %16 = vector.broadcast %cst : f32 to vector<2x4x4xf32>
      %c0 = arith.constant 0 : index
      %c0_8 = arith.constant 0 : index
      %c0_9 = arith.constant 0 : index
      %17 = vector.load %arg6[%c0, %c0_8, %c0_9] : memref<2x4x4xf32, #tpu.memory_space<vmem>>, vector<2x4x4xf32>
      tpu.vector_store %arg6[%c0, %c0_8, %c0_9], %16 {strides = array<i32>} : memref<2x4x4xf32, #tpu.memory_space<vmem>>, vector<2x4x4xf32>,
    } else {
    }
    %c0_i32_2 = arith.constant 0 : i32
    %5 = arith.cmpi eq, %arg1, %c0_i32_2 : i32
    %6 = arith.extui %5 : i1 to i32
    %c0_i32_3 = arith.constant 0 : i32
    %7 = arith.cmpi ne, %6, %c0_i32_3 : i32
    scf.if %7 {
      %c0 = arith.constant 0 : index
      %c0_8 = arith.constant 0 : index
      %c0_9 = arith.constant 0 : index
      %16 = vector.load %arg4[%c0, %c0_8, %c0_9] : memref<2x4x256xf32, #tpu.memory_space<vmem>>, vector<2x4x256xf32>
      %c0_10 = arith.constant 0 : index
      %c0_11 = arith.constant 0 : index
      %c0_12 = arith.constant 0 : index
      %17 = vector.load %arg6[%c0_10, %c0_11, %c0_12] : memref<2x4x4xf32, #tpu.memory_space<vmem>>, vector<2x4x4xf32>
      %cst = arith.constant dense<0.000000e+00> : vector<2x4x4xf32>
      %18 = tpu.matmul %16, %16, %cst {dimension_numbers = #tpu.dot_dimension_numbers<[2], [2], [1], [1], [0, 0, 0, 1, 1, 1], [0], [0]>} : vector<2x4x256xf32>, vector<2x4x256xf32>, vector<2x4x4xf32> -> vector<2x4x4xf32>
      %19 = arith.addf %17, %18 : vector<2x4x4xf32>
      %c0_13 = arith.constant 0 : index
      %c0_14 = arith.constant 0 : index
      %c0_15 = arith.constant 0 : index
      %20 = vector.load %arg6[%c0_13, %c0_14, %c0_15] : memref<2x4x4xf32, #tpu.memory_space<vmem>>, vector<2x4x4xf32>
      tpu.vector_store %arg6[%c0_13, %c0_14, %c0_15], %19 {strides = array<i32>} : memref<2x4x4xf32, #tpu.memory_space<vmem>>, vector<2x4x4xf32>,
    } else {
    }
    %c1_i32 = arith.constant 1 : i32
    %8 = arith.cmpi eq, %arg1, %c1_i32 : i32
    %c0_i32_4 = arith.constant 0 : i32
    %9 = arith.cmpi eq, %arg2, %c0_i32_4 : i32
    %10 = arith.andi %8, %9 : i1
    %11 = arith.extui %10 : i1 to i32
    %c0_i32_5 = arith.constant 0 : i32
    %12 = arith.cmpi ne, %11, %c0_i32_5 : i32
    scf.if %12 {
      %c0 = arith.constant 0 : index
      %c0_8 = arith.constant 0 : index
      %c0_9 = arith.constant 0 : index
      %16 = vector.load %arg6[%c0, %c0_8, %c0_9] : memref<2x4x4xf32, #tpu.memory_space<vmem>>, vector<2x4x4xf32>
      %cst = arith.constant dense<0x7F800000> : vector<2x4xf32>
      %17 = vector.multi_reduction <minimumf>, %16, %cst [1] : vector<2x4x4xf32> to vector<2x4xf32>
      %18 = vector.shape_cast %17 : vector<2x4xf32> to vector<2x1x4xf32>
      %19 = vector.broadcast %18 : vector<2x1x4xf32> to vector<2x4x4xf32>
      %20 = arith.subf %19, %16 : vector<2x4x4xf32>
      %21 = math.exp %20 : vector<2x4x4xf32>
      %cst_10 = arith.constant dense<0.000000e+00> : vector<2x4xf32>
      %22 = vector.multi_reduction <add>, %21, %cst_10 [1] : vector<2x4x4xf32> to vector<2x4xf32>
      %23 = vector.shape_cast %22 : vector<2x4xf32> to vector<2x1x4xf32>
      %24 = tpu.reciprocal %23 : vector<2x1x4xf32> -> vector<2x1x4xf32>
      %25 = vector.broadcast %24 : vector<2x1x4xf32> to vector<2x4x4xf32>
      %26 = arith.mulf %21, %25 : vector<2x4x4xf32>
      %c0_11 = arith.constant 0 : index
      %c0_12 = arith.constant 0 : index
      %c0_13 = arith.constant 0 : index
      %27 = vector.load %arg7[%c0_11, %c0_12, %c0_13] : memref<2x4x4xf32, #tpu.memory_space<vmem>>, vector<2x4x4xf32>
      tpu.vector_store %arg7[%c0_11, %c0_12, %c0_13], %26 {strides = array<i32>} : memref<2x4x4xf32, #tpu.memory_space<vmem>>, vector<2x4x4xf32>,
    } else {
    }
    %c1_i32_6 = arith.constant 1 : i32
    %13 = arith.cmpi eq, %arg1, %c1_i32_6 : i32
    %14 = arith.extui %13 : i1 to i32
    %c0_i32_7 = arith.constant 0 : i32
    %15 = arith.cmpi ne, %14, %c0_i32_7 : i32
    scf.if %15 {
      %c0 = arith.constant 0 : index
      %c0_8 = arith.constant 0 : index
      %c0_9 = arith.constant 0 : index
      %16 = vector.load %arg4[%c0, %c0_8, %c0_9] : memref<2x4x256xf32, #tpu.memory_space<vmem>>, vector<2x4x256xf32>
      %c0_10 = arith.constant 0 : index
      %c0_11 = arith.constant 0 : index
      %c0_12 = arith.constant 0 : index
      %17 = vector.load %arg7[%c0_10, %c0_11, %c0_12] : memref<2x4x4xf32, #tpu.memory_space<vmem>>, vector<2x4x4xf32>
      %cst = arith.constant dense<0.000000e+00> : vector<2x4x256xf32>
      %18 = tpu.matmul %17, %16, %cst {dimension_numbers = #tpu.dot_dimension_numbers<[2], [1], [1], [2], [0, 0, 0, 1, 1, 2], [0], [0]>} : vector<2x4x4xf32>, vector<2x4x256xf32>, vector<2x4x256xf32> -> vector<2x4x256xf32>
      %c0_13 = arith.constant 0 : index
      %19 = memref.load %arg3[%c0_13] : memref<1xf32, #tpu.memory_space<smem>>
      %20 = vector.broadcast %19 : f32 to vector<2x4x256xf32>
      %21 = arith.mulf %20, %18 : vector<2x4x256xf32>
      %22 = arith.addf %21, %16 : vector<2x4x256xf32>
      %c0_14 = arith.constant 0 : index
      %c0_15 = arith.constant 0 : index
      %c0_16 = arith.constant 0 : index
      %23 = vector.load %arg5[%c0_14, %c0_15, %c0_16] : memref<2x4x256xf32, #tpu.memory_space<vmem>>, vector<2x4x256xf32>
      tpu.vector_store %arg5[%c0_14, %c0_15, %c0_16], %22 {strides = array<i32>} : memref<2x4x256xf32, #tpu.memory_space<vmem>>, vector<2x4x256xf32>,
    } else {
    }
    return
  }
  func.func @transform_0(%arg0: i32, %arg1: i32, %arg2: i32) -> i32 {
    %c0_i32 = arith.constant 0 : i32
    %c0_i32_0 = arith.constant 0 : i32
    return %c0_i32 : i32
  }
  func.func @transform_1(%arg0: i32, %arg1: i32, %arg2: i32) -> (i32, i32, i32) {
    %c0_i32 = arith.constant 0 : i32
    %c0_i32_0 = arith.constant 0 : i32
    return %arg0, %c0_i32, %arg2 : i32, i32, i32
  }
  func.func @transform_2(%arg0: i32, %arg1: i32, %arg2: i32) -> (i32, i32, i32) {
    %0 = arith.muli %arg2, %arg1 : i32
    %c0_i32 = arith.constant 0 : i32
    %c0_i32_0 = arith.constant 0 : i32
    return %arg0, %c0_i32, %0 : i32, i32, i32
  }
}

</mosaic_0001>

<bundles_post_ra>
// kernel: tpu_custom_call.1
= control target key start
LH: loop header
LB: loop body
LE: loop exit
PB: predicated region body
PF: predicated region fallthrough
CT: control target
= control target key end

     0   :  { %s991_s0 = inlined_call_operand.<no memory space> [shape: f32[1], index: 0, kind: input, shape index: {}]   ;;  %s992_s1 = inlined_call_operand.hbm [shape: f32[2,4,256], index: 1, kind: input, shape index: {}]   ;;  %s993_s2 = inlined_call_operand.hbm [shape: f32[2,4,256], index: 2, kind: output, shape index: {}]  }
   0x1   :  { %7 = sst [smem:[#allocation4]] %s991_s0 }
   0x2   :  { %8 = vsyncpa [#allocation6], 0 }
   0x3   :  { %9 = vsyncpa [#allocation7], 0 }
   0x4   :  { %11 = vsyncpa [#allocation7 + $0x1], 0  ;;  %s883_s11 = smov 0   ;;  %s885_s12 = smov 0  }
   0x5   :  { %s887_s13 = smov 0  }
   0x6 LB: > { %s684_s0 = sadd.s32 4294967295, %s855_s13   ;;  %s685_s14 = sadd.s32 4294967294, %s855_s13   ;;  %s855_s13 = sphi %s887_s13, %s17_s13   ;;  %s851_s12 = sphi %s885_s12, %s1004_s12   ;;  %s847_s11 = sphi %s883_s11, %s1003_s11  }
   0x7   : > { %s32_s15 = sadd.s32 1, %s851_s12  ;;  %p686_p0 = scmp.ge.s32.totalorder %s855_s13, 1 }
   0x8   : > { %p34_p1 = scmp.ge.s32.totalorder %s32_s15, 2  ;;  %p120_p2 = scmp.lt.s32.totalorder %s855_s13, 3 }
   0x9   : > { %p905_p3 = scmp.eq.s32.totalorder %s684_s0, 0  ;;  %s857_s18 = smov [#allocation5]  }
   0xa   : > { %s1006_s15 = smov (%p34_p1, %s32_s15), 0  ;;  %p911_p4 = pnand %p686_p0, %p120_p2 }
   0xb   : > { %s997_s16 = scalar_select %p905_p3, 1, 0 }
   0xc   : > { %s998_s17 = scalar_select %p911_p4, 1, 0 }
   0xd   : > { %s141_s19 = sshll.u32 %s857_s18, 4  ;;  %p714_p5 = pneg %p911_p4  ;;  %s142_s19 = int_to_ptr.vmem [resolvable:$true] %s141_s19 }
   0xe   : > { %s771_s23 = scalar_lea.hbm %s992_s1, 256 }
   0xf   : > { %p919_p6 = pnand %p905_p3, %p714_p5  ;;  %p772_p7 = scmp.ne.s32.totalorder %s992_s1, %s771_s23 }
  0x10   : > { %p778_p11 = scmp.lt.u32.totalorder %s771_s23, %s992_s1 }
  0x11   : > { %p773_p8 = pneg %p919_p6 }
  0x13   : > { %p774_p9 = pnand %p773_p8, %p772_p7 }
  0x15   : > { %p775_p10 = pneg %p774_p9 }
  0x17   : > { %p780_p12 = pnand %p778_p11, %p775_p10 }
  0x19   : > { %783 = shalt.err (!%p780_p12)
}
  0x1a   : > { %s784_s28 = scalar_lea.vmem %s142_s19, 256  ;;  %p792_p2 = scmp.lt.s32.totalorder %s142_s19, %s142_s19 }
  0x1b   : > { %p785_p13 = scmp.ne.s32.totalorder %s142_s19, %s784_s28  ;;  %p793_p5 = scmp.lt.s32.totalorder %s784_s28, %s784_s28 }
  0x1d   : > { %p787_p0 = pnand %p785_p13, %p773_p8  ;;  %p794_p3 = por %p793_p5, %p792_p2 }
  0x1f   : > { %p788_p1 = pneg %p787_p0 }
  0x21   : > { %p795_p4 = pnand %p794_p3, %p788_p1 }
  0x23   : > { %798 = shalt.err (!%p795_p4)
}
  0x24   : > { %s858_s29 = smov 128   ;;  %s859_s30 = smov 8  }
  0x25   : > { %717 = dma.hbm_to_vmem [thread:$0]  (!%p919_p6), %s992_s1, 256, %s142_s19, [#allocation6], %s858_s29, %s858_s29, %s859_s30  }
  0x26   : > { %p1000_p7 = scmp.ne.s32.totalorder %s998_s17, 0 }
  0x27   : > { %p1001_p9 = scmp.ne.s32.totalorder (!%p1000_p7), %s997_s16, 0 }
  0x28   : > { %157 = sbr.rel (%p1000_p7) target bundleno = 594 (0x252), region = 28 }
  0x2f   : > { %838 = dma.done.wait (%p1001_p9), [#allocation6], 256  }
  0x30   : > { %840 = vsyncadd (%p1001_p9), [#allocation6], 4294967040  ;;  %p179_p3 = scmp.eq.s32.totalorder %s847_s11, 0 }
  0x31   : > { %vm185_vm0 = vcmask (%p179_p3), 27648   ;;  %v860_v0 = vmov (%p179_p3), 0.0  }
  0x32   : > { %184 = sbr.rel (!%p179_p3) target bundleno = 57 (0x39), region = 36  ;;  %186 = vst.msk [vmem:[#allocation2] sm:$0xf] (%p179_p3), %vm185_vm0, %v860_v0  ;;  %187 = vst.msk [vmem:[#allocation2 + $0x4] sm:$0xf] (%p179_p3), %vm185_vm0, %v860_v0 }
  0x39 PF: > { %p691_p4 = scmp.ne.s32.totalorder %s847_s11, 0 }
  0x3a   : > { %v191_v1 = vld [vmem:[#allocation5] sm:$0xff] (!%p691_p4)  ;;  %v192_v2 = vld [vmem:[#allocation5 + $0x8] sm:$0xff] (!%p691_p4)  ;;  %v193_v5 = vld [vmem:[#allocation2] sm:$0xf] (!%p691_p4)  ;;  %vm343_vm1 = vcmask (!%p691_p4), 27648  }
  0x3b   : > { %190 = sbr.rel (%p691_p4) target bundleno = 280 (0x118), region = 40  ;;  %v196_v3 = vcombine.high (!%p691_p4), %v191_v1, %v191_v1  ;;  %v269_v4 = vcombine.high (!%p691_p4), %v192_v2, %v192_v2  ;;  %v194_v6 = vld [vmem:[#allocation2 + $0x4] sm:$0xf] (!%p691_p4) }
  0x3d   : > { %198 = vmatprep.subr.mxu0 (!%p691_p4), %v196_v3  ;;  %271 = vmatprep.subr.mxu1 (!%p691_p4), %v269_v4 }
  0x3e   : > { %199 = vmatpush1.xpose.msra.mxu0 (!%p691_p4), %v191_v1  ;;  %272 = vmatpush1.xpose.msra.mxu1 (!%p691_p4), %v192_v2 }
  0x3f   : > { %262 = vmatprep.mubr.f32.mxu0 (!%p691_p4), %v196_v3  ;;  %335 = vmatprep.mubr.f32.mxu1 (!%p691_p4), %v269_v4 }
  0x41   : > { %263 = vmatmul.mubr.f32.vlgmr.msra.gmra.mrb[0].mxu0 (!%p691_p4), %v191_v1  ;;  %336 = vmatmul.mubr.f32.vlgmr.msra.gmra.mrb[0].mxu1 (!%p691_p4), %v192_v2 }
 0x114   : > { %v264_v7 = vpop.f32.mrb[0].mxu0  ;;  %v337_v8 = vpop.f32.mrb[0].mxu1 }
 0x115   : > { %v341_v9 = vadd.f32 %v264_v7, %v193_v5  ;;  %v342_v10 = vadd.f32 %v337_v8, %v194_v6  ;;  %v266_v11 = vpop.f32.mrb[1].mxu0  ;;  %v339_v12 = vpop.f32.mrb[1].mxu1 }
 0x117   : > { %344 = vst.msk [vmem:[#allocation2] sm:$0xf] %vm343_vm1, %v341_v9  ;;  %345 = vst.msk [vmem:[#allocation2 + $0x4] sm:$0xf] %vm343_vm1, %v342_v10 }
 0x118 PF: > { %p346_p6 = scmp.eq.s32.totalorder %s847_s11, 1 }
 0x119   : > { %vm353_vm2 = vcmask (%p346_p6), 27648  }
 0x11a   : > { %350 = sbr.rel (!%p346_p6) target bundleno = 343 (0x157), region = 44 }
 0x11e   : > { %v351_v13 = vld [vmem:[#allocation2] sm:$0xf] (%p346_p6)  ;;  %v352_v14 = vld [vmem:[#allocation2 + $0x4] sm:$0xf] (%p346_p6) }
 0x11f   : > { %v354_v15 = vsel (%p346_p6), %vm353_vm2, %v351_v13, inf  ;;  %v361_v16 = vsel (%p346_p6), %vm353_vm2, %v352_v14, inf }
 0x120   : > { %v355_v17 = vrot.slane (%p346_p6), %v354_v15, 4  ;;  %v362_v18 = vrot.slane (%p346_p6), %v361_v16, 4 }
 0x122   : > { %v356_v19 = vmin.f32 %v354_v15, %v355_v17  ;;  %v363_v20 = vmin.f32 %v361_v16, %v362_v18 }
 0x124   : > { %v357_v21 = vrot.slane %v356_v19, 2  ;;  %v364_v22 = vrot.slane %v363_v20, 2 }
 0x126   : > { %v358_v23 = vmin.f32 %v356_v19, %v357_v21  ;;  %v365_v24 = vmin.f32 %v363_v20, %v364_v22 }
 0x128   : > { %v359_v25 = vrot.slane %v358_v23, 1  ;;  %v366_v26 = vrot.slane %v365_v24, 1 }
 0x12a   : > { %v360_v27 = vmin.f32 %v358_v23, %v359_v25  ;;  %v367_v28 = vmin.f32 %v365_v24, %v366_v26 }
 0x12c   : > { %v368_v29 = vsub.f32 %v360_v27, %v351_v13  ;;  %v369_v30 = vsub.f32 %v367_v28, %v352_v14 }
 0x12e   : > { %v370_v31 = vmul.f32 1.442695, %v368_v29  ;;  %v372_v32 = vmul.f32 1.442695, %v369_v30 }
 0x130   : > { %761 = vpow2.f32 %v370_v31 }
 0x131   : > { %763 = vpow2.f32 %v372_v32 }
 0x13a   : > { %v762_v33 = vpop.eup %761 }
 0x13b   : > { %v764_v34 = vpop.eup %763  ;;  %v374_v35 = vsel %vm353_vm2, %v762_v33, 0.0 }
 0x13c   : > { %v375_v36 = vrot.slane %v374_v35, 4  ;;  %v381_v37 = vsel %vm353_vm2, %v764_v34, 0.0 }
 0x13d   : > { %v382_v38 = vrot.slane %v381_v37, 4 }
 0x13e   : > { %v376_v39 = vadd.f32 %v375_v36, %v374_v35 }
 0x13f   : > { %v383_v40 = vadd.f32 %v382_v38, %v381_v37 }
 0x140   : > { %v377_v41 = vrot.slane %v376_v39, 2 }
 0x141   : > { %v384_v42 = vrot.slane %v383_v40, 2 }
 0x142   : > { %v378_v43 = vadd.f32 %v377_v41, %v376_v39 }
 0x143   : > { %v385_v44 = vadd.f32 %v384_v42, %v383_v40 }
 0x144   : > { %v379_v45 = vrot.slane %v378_v43, 1 }
 0x145   : > { %v386_v46 = vrot.slane %v385_v44, 1 }
 0x146   : > { %v380_v47 = vadd.f32 %v379_v45, %v378_v43 }
 0x147   : > { %v387_v48 = vadd.f32 %v386_v46, %v385_v44 }
 0x148   : > { %765 = vrcp.f32 %v380_v47 }
 0x149   : > { %767 = vrcp.f32 %v387_v48 }
 0x152   : > { %v766_v49 = vpop.eup %765 }
 0x153   : > { %v768_v50 = vpop.eup %767  ;;  %v390_v51 = vmul.f32 %v766_v49, %v762_v33 }
 0x154   : > { %v391_v52 = vmul.f32 %v768_v50, %v764_v34 }
 0x155   : > { %392 = vst.msk [vmem:[#allocation3] sm:$0xf] %vm353_vm2, %v390_v51 }
 0x156   : > { %393 = vst.msk [vmem:[#allocation3 + $0x4] sm:$0xf] %vm353_vm2, %v391_v52 }
 0x157 PF: > { %p693_p8 = scmp.ne.s32.totalorder %s847_s11, 1 }
 0x158   : > { %v397_v53 = vld [vmem:[#allocation5] sm:$0xff] (!%p693_p8)  ;;  %vm407_vm3 = vcmask (!%p693_p8), 1043456   ;;  %v398_v54 = vld [vmem:[#allocation5 + $0x8] sm:$0xff] (!%p693_p8)  ;;  %v861_v57 = vmov (!%p693_p8), 0.0   ;;  %vm403_vm4 = vcmask (!%p693_p8), 31744   ;;  %s563_s5 = sld [smem:[#allocation4]] (!%p693_p8) }
 0x159   : > { %396 = sbr.rel (%p693_p8) target bundleno = 570 (0x23a), region = 48  ;;  %v402_v55 = vcombine.high (!%p693_p8), %v397_v53, %v397_v53  ;;  %v484_v56 = vcombine.high (!%p693_p8), %v398_v54, %v398_v54  ;;  %476 = vmatprep.mubr.f32.mxu0 (!%p693_p8), %v861_v57  ;;  %556 = vmatprep.mubr.f32.mxu1 (!%p693_p8), %v861_v57 }
 0x15b   : > { %694 = vmatprep.subr.msk.mxu0 (!%p693_p8), %vm407_vm3, %v402_v55  ;;  %697 = vmatprep.subr.msk.mxu1 (!%p693_p8), %vm407_vm3, %v484_v56 }
 0x15c   : > { %v399_v58 = vld [vmem:[#allocation3] sm:$0xf] (!%p693_p8)  ;;  %695 = vmatpush1.msk.msra.mxu0 (!%p693_p8), %vm407_vm3, %v397_v53  ;;  %698 = vmatpush1.msk.msra.mxu1 (!%p693_p8), %vm407_vm3, %v398_v54 }
 0x15d   : > { %v400_v59 = vld [vmem:[#allocation3 + $0x4] sm:$0xf] (!%p693_p8)  ;;  %696 = vmatmul.mubr.msk.f32.vlgmr.msra.gmra.mrb[0].mxu0 (!%p693_p8), %vm403_vm4, %v399_v58 }
 0x15e   : > { %699 = vmatmul.mubr.msk.f32.vlgmr.msra.gmra.mrb[0].mxu1 (!%p693_p8), %vm403_vm4, %v400_v59  ;;  %v564_v60 = vstv (!%p693_p8), %s563_s5 }
 0x230   : > { %v478_v61 = vpop.f32.mrb[0].mxu0 }
 0x231   : > { %v558_v62 = vpop.f32.mrb[0].mxu1  ;;  %v565_v63 = vmul.f32 %v564_v60, %v478_v61  ;;  %v480_v1 = vpop.f32.mrb[1].mxu0 }
 0x232   : > { %v567_v0 = vmul.f32 %v564_v60, %v558_v62  ;;  %v560_v2 = vpop.f32.mrb[1].mxu1  ;;  %v566_v3 = vmul.f32 %v564_v60, %v480_v1 }
 0x233   : > { %v568_v4 = vmul.f32 %v564_v60, %v560_v2  ;;  %v571_v5 = vadd.f32 %v565_v63, %v397_v53 }
 0x234   : > { %v573_v6 = vadd.f32 %v567_v0, %v398_v54  ;;  %v572_v7 = vadd.f32 %v566_v3, %v402_v55 }
 0x235   : > { %v574_v8 = vadd.f32 %v568_v4, %v484_v56 }
 0x236   : > { %v579_v9 = vcombine.low %v571_v5, %v572_v7 }
 0x237   : > { %v580_v10 = vcombine.low %v573_v6, %v574_v8 }
 0x238   : > { %583 = vst [vmem:[#allocation8] sm:$0xff] %v579_v9 }
 0x239   : > { %584 = vst [vmem:[#allocation8 + $0x8] sm:$0xff] %v580_v10 }
 0x23a PF: > { %p957_p10 = scmp.eq.s32.totalorder %s684_s0, 1  ;;  %s862_s7 = smov [#allocation8]  }
 0x23b   : > { %s603_s8 = sshll.u32 %s862_s7, 4  ;;  %s604_s8 = int_to_ptr.vmem [resolvable:$true] %s603_s8 }
 0x23c   : > { %s799_s9 = scalar_lea.vmem %s604_s8, 256  ;;  %s805_s10 = scalar_lea.vmem %s604_s8, 512 }
 0x23d   : > { %p800_p11 = scmp.ne.s32.totalorder %s604_s8, %s799_s9  ;;  %p806_p0 = scmp.lt.s32.totalorder %s604_s8, %s604_s8 }
 0x23e   : > { %p807_p1 = scmp.lt.s32.totalorder %s805_s10, %s799_s9 }
 0x23f   : > { %p801_p12 = pnand %p800_p11, %p957_p10 }
 0x240   : > { %p808_p2 = por %p807_p1, %p806_p0 }
 0x241   : > { %p802_p13 = pneg %p801_p12 }
 0x243   : > { %p809_p5 = pnand %p808_p2, %p802_p13 }
 0x245   : > { %812 = shalt.err (!%p809_p5)
}
 0x246   : > { %s813_s16 = scalar_lea.hbm %s993_s2, 256 }
 0x247   : > { %p814_p7 = scmp.ne.s32.totalorder %s993_s2, %s813_s16  ;;  %p819_p4 = scmp.lt.u32.totalorder %s813_s16, %s993_s2 }
 0x249   : > { %p815_p9 = pnand %p814_p7, %p957_p10 }
 0x24b   : > { %p816_p3 = pneg %p815_p9 }
 0x24d   : > { %p821_p6 = pnand %p819_p4, %p816_p3 }
 0x24f   : > { %824 = shalt.err (!%p821_p6)
}
 0x250   : > { %s863_s21 = smov 128   ;;  %s864_s22 = smov 8  }
 0x251   : > { %711 = dma.vmem_to_hbm [thread:$0]  (%p957_p10), %s604_s8, 256, %s993_s2, [#allocation7], %s863_s21, %s863_s21, %s864_s22  }
 0x252 PF: > { %p725_p8 = scmp.ge.s32.totalorder %s855_s13, 2  ;;  %p726_p11 = scmp.eq.s32.totalorder %s685_s14, 1 }
 0x254   : > { %p719_p12 = pnand %p726_p11, %p725_p8 }
 0x256   : > { %842 = dma.done.wait (!%p719_p12), [#allocation7], 256  }
 0x257   : > { %844 = vsyncadd (!%p719_p12), [#allocation7], 4294967040  ;;  %s17_s13 = sadd.s32 1, %s855_s13   ;;  %s1003_s11 = smov %s851_s12 }
 0x258   : > { %p14_p13 = scmp.ge.s32.totalorder %s17_s13, 4   ;;  %s1004_s12 = smov %s1006_s15 }
 0x25a   :  { %16 = sbr.rel (!%p14_p13) target bundleno = 6 (0x6), region = 82 }
 0x261   :  { %624 = vsyncpa [#allocation6], 1 }
 0x262   :  { %626 = vsyncpa [#allocation6 + $0x1], 1 }
 0x263   :  { %627 = vsyncpa [#allocation7], 1 }
 0x264   :  { %629 = vsyncpa [#allocation7 + $0x1], 1 }

</bundles_post_ra>
